<compile_context>
chip_gen: v7x
topology: tpu7x:2x2x1
jax: 0.10.0
libtpu: 0.0.40
codegen_flags: <defaults>
</compile_context>

<pallas_src>
import functools

import jax
import jax.numpy as jnp
from jax.experimental import pallas as pl
from jax.experimental.pallas import tpu as pltpu


_SUBLANE_MULT = 32                      # row-tile multiple; safe for f32 / bf16 / int8
_TARGET_BLOCK_BYTES = 768 * 1024        # ~0.75 MiB input block (streaming roofline hit by ~512 rows)
_TARGET_GRID_STEPS = 8                  # >= 4 steps per TensorCore on v7x megacore
_VMEM_LIMIT_BYTES = 32 * 1024 * 1024    # headroom even on v7x (64 MiB physical VMEM)


def _rmsnorm_kernel(*refs, eps, d, groups, with_scale, with_bias):
    """refs = (x_ref, [seg_ref], [scale_ref], [bias_ref], o_ref).

    x_ref / o_ref: (tile_rows, groups*d).  When groups > 1 each lane row packs
    `groups` logical rows of width d (lane-dense layout for small d).
    """
    x_ref, o_ref = refs[0], refs[-1]
    i = 1
    seg_ref = scale_ref = bias_ref = None
    if groups > 1:
        seg_ref = refs[i]; i += 1
    if with_scale:
        scale_ref = refs[i]; i += 1
    if with_bias:
        bias_ref = refs[i]; i += 1

    x = x_ref[...].astype(jnp.float32)

    if groups == 1:
        ms = jnp.mean(x * x, axis=-1, keepdims=True)
    else:
        # One (tile, dp) @ (dp, dp) block-diagonal matmul both reduces each
        # d-wide lane group and broadcasts the group's sum back across its
        # lanes.  bf16 operands use the native MXU pass; the exact hi/lo split
        # of x*x keeps the sum at ~f32 accuracy (seg is exact 0/1 in bf16).
        xx = x * x
        hi = xx.astype(jnp.bfloat16)
        lo = (xx - hi.astype(jnp.float32)).astype(jnp.bfloat16)
        seg = seg_ref[...]
        ss = (jnp.dot(hi, seg, preferred_element_type=jnp.float32)
              + jnp.dot(lo, seg, preferred_element_type=jnp.float32))
        ms = ss * (1.0 / d)

    inv = jax.lax.rsqrt(ms + eps)        # EUP rsqrt; no full-width divide
    y = x * inv
    if with_scale:
        y = y * scale_ref[...].astype(jnp.float32)   # read once, broadcast over rows
    if with_bias:
        y = y + bias_ref[...].astype(jnp.float32)
    o_ref[...] = y.astype(o_ref.dtype)


def rmsnorm(x, scale=None, bias=None, *, eps=1e-8, with_scale=False, with_bias=False):
    """RMSNorm over the last axis of x (matches the PyTorch reference)."""
    orig_shape = x.shape
    d = orig_shape[-1]
    rows = 1
    for s in orig_shape[:-1]:
        rows *= s
    x2 = x.reshape(rows, d)

    # Lane-dense repack for small feature dims (d divides 128).
    groups = (128 // d) if (d < 128 and 128 % d == 0) else 1
    # TODO(synk): d that is neither a multiple of 128 nor a divisor of 128
    # (e.g. 48, 80, 200) falls back to groups=1 with lane width d (masked
    # stores); lane padding + in-kernel masking would make those lane-dense too.
    dp = groups * d

    # Pad at most (groups - 1) rows so the (rows, d) -> (packed_rows, dp)
    # reshape is valid; the ragged last row-block is handled by the grid.
    pad_rows = (-rows) % groups
    if pad_rows:
        x2 = jnp.pad(x2, ((0, pad_rows), (0, 0)))
    packed_rows = (rows + pad_rows) // groups
    xp = x2.reshape(packed_rows, dp)

    # Small row tile (~0.75 MiB input block), capped so the grid keeps
    # >= _TARGET_GRID_STEPS steps when the row count allows.  If the whole
    # array fits in one tile, use a single full-extent block.
    itemsize = jnp.dtype(x.dtype).itemsize
    bytes_per_row = dp * itemsize
    tile = max(_SUBLANE_MULT,
               (_TARGET_BLOCK_BYTES // bytes_per_row) // _SUBLANE_MULT * _SUBLANE_MULT)
    cap = pl.cdiv(pl.cdiv(packed_rows, _TARGET_GRID_STEPS), _SUBLANE_MULT) * _SUBLANE_MULT
    tile = min(tile, max(_SUBLANE_MULT, cap))
    if tile >= packed_rows:
        tile = packed_rows
    grid = pl.cdiv(packed_rows, tile)

    args = [xp]
    in_specs = [pl.BlockSpec((tile, dp), lambda i: (i, 0))]
    if groups > 1:
        gid = jnp.arange(dp, dtype=jnp.int32) // d
        seg = (gid[:, None] == gid[None, :]).astype(jnp.bfloat16)  # block-diag ones
        args.append(seg)
        in_specs.append(pl.BlockSpec((dp, dp), lambda i: (0, 0)))  # fetched once
    if with_scale:
        s = scale.reshape(-1)
        if groups > 1:
            s = jnp.tile(s, (groups,))
        args.append(s.reshape(1, dp))
        in_specs.append(pl.BlockSpec((1, dp), lambda i: (0, 0)))
    if with_bias:
        b = bias.reshape(-1)
        if groups > 1:
            b = jnp.tile(b, (groups,))
        args.append(b.reshape(1, dp))
        in_specs.append(pl.BlockSpec((1, dp), lambda i: (0, 0)))

    kernel = functools.partial(
        _rmsnorm_kernel, eps=float(eps), d=d, groups=groups,
        with_scale=with_scale, with_bias=with_bias)

    out = pl.pallas_call(
        kernel,
        out_shape=jax.ShapeDtypeStruct((packed_rows, dp), x.dtype),
        grid_spec=pltpu.PrefetchScalarGridSpec(
            num_scalar_prefetch=0,
            grid=(grid,),
            in_specs=in_specs,
            out_specs=pl.BlockSpec((tile, dp), lambda i: (i, 0)),
        ),
        compiler_params=pltpu.CompilerParams(
            dimension_semantics=("parallel",),
            vmem_limit_bytes=_VMEM_LIMIT_BYTES),
    )(*args)

    out = out.reshape(packed_rows * groups, d)
    if pad_rows:
        out = out[:rows]
    return out.reshape(orig_shape)


def rmsnorm_ref(x, scale=None, bias=None, *, eps=1e-8, with_scale=False, with_bias=False):
    xf = x.astype(jnp.float32)
    ms = jnp.mean(jnp.square(xf), axis=-1, keepdims=True)
    y = xf / jnp.sqrt(ms + eps)
    if with_scale:
        y = y * scale.astype(jnp.float32)
    if with_bias:
        y = y + bias.astype(jnp.float32)
    return y.astype(x.dtype)


if __name__ == "__main__":
    # Module config: d=32 (hidden), axis=-1, eps=1e-8, with_scale/with_bias=True
    batch, seq, d = 2, 8, 32
    eps = 1e-8

    key = jax.random.PRNGKey(0)
    kx, ks, kb = jax.random.split(key, 3)
    x = jax.random.normal(kx, (batch, seq, d), dtype=jnp.float32)
    # torch.rand -> uniform[0, 1)
    scale = jax.random.uniform(ks, (d,), dtype=jnp.float32)
    bias = jax.random.uniform(kb, (d,), dtype=jnp.float32)

    y = rmsnorm(x, scale, bias, eps=eps, with_scale=True, with_bias=True)
    y = jax.block_until_ready(y)

    y_ref = rmsnorm_ref(x, scale, bias, eps=eps, with_scale=True, with_bias=True)
    assert y.shape == x.shape and y.dtype == x.dtype
    assert jnp.allclose(y, y_ref, atol=1e-5, rtol=1e-5), "mismatch vs reference"

    print("KERNEL_OK")
</pallas_src>

<mosaic_0001>
module attributes {stable_mosaic.version = 11 : i64} {
  func.func @_rmsnorm_kernel(%arg0: i32, %arg1: memref<4x128xf32, #tpu.memory_space<vmem>>, %arg2: memref<128x128xbf16, #tpu.memory_space<vmem>>, %arg3: memref<1x128xf32, #tpu.memory_space<vmem>>, %arg4: memref<1x128xf32, #tpu.memory_space<vmem>>, %arg5: memref<4x128xf32, #tpu.memory_space<vmem>>) attributes {dimension_semantics = [#tpu.dimension_semantics<parallel>], iteration_bounds = array<i64: 1>, scalar_prefetch = 0 : i64, scratch_operands = 0 : i64, tpu.core_type = #tpu.core_type<tc>, window_params = [{transform_indices = @transform_0, window_bounds = array<i64: 4, 128>}, {pipeline_mode = #tpu.pipeline_mode<synchronous>, transform_indices = @transform_1, window_bounds = array<i64: 128, 128>}, {pipeline_mode = #tpu.pipeline_mode<synchronous>, transform_indices = @transform_2, window_bounds = array<i64: 1, 128>}, {pipeline_mode = #tpu.pipeline_mode<synchronous>, transform_indices = @transform_3, window_bounds = array<i64: 1, 128>}, {transform_indices = @transform_4, window_bounds = array<i64: 4, 128>}]} {
    %c0 = arith.constant 0 : index
    %c0_0 = arith.constant 0 : index
    %0 = vector.load %arg1[%c0, %c0_0] : memref<4x128xf32, #tpu.memory_space<vmem>>, vector<4x128xf32>
    %1 = arith.mulf %0, %0 : vector<4x128xf32>
    %2 = arith.truncf %1 : vector<4x128xf32> to vector<4x128xbf16>
    %3 = arith.extf %2 : vector<4x128xbf16> to vector<4x128xf32>
    %4 = arith.subf %1, %3 : vector<4x128xf32>
    %5 = arith.truncf %4 : vector<4x128xf32> to vector<4x128xbf16>
    %c0_1 = arith.constant 0 : index
    %c0_2 = arith.constant 0 : index
    %6 = vector.load %arg2[%c0_1, %c0_2] : memref<128x128xbf16, #tpu.memory_space<vmem>>, vector<128x128xbf16>
    %cst = arith.constant dense<0.000000e+00> : vector<4x128xf32>
    %7 = tpu.matmul %2, %6, %cst {dimension_numbers = #tpu.dot_dimension_numbers<[1], [0], [0], [1], [0, 0, 1, 1], [], []>} : vector<4x128xbf16>, vector<128x128xbf16>, vector<4x128xf32> -> vector<4x128xf32>
    %cst_3 = arith.constant dense<0.000000e+00> : vector<4x128xf32>
    %8 = tpu.matmul %5, %6, %cst_3 {dimension_numbers = #tpu.dot_dimension_numbers<[1], [0], [0], [1], [0, 0, 1, 1], [], []>} : vector<4x128xbf16>, vector<128x128xbf16>, vector<4x128xf32> -> vector<4x128xf32>
    %9 = arith.addf %7, %8 : vector<4x128xf32>
    %cst_4 = arith.constant 3.125000e-02 : f32
    %10 = vector.broadcast %cst_4 : f32 to vector<4x128xf32>
    %11 = arith.mulf %9, %10 : vector<4x128xf32>
    %cst_5 = arith.constant 9.99999993E-9 : f32
    %12 = vector.broadcast %cst_5 : f32 to vector<4x128xf32>
    %13 = arith.addf %11, %12 : vector<4x128xf32>
    %14 = math.rsqrt %13 : vector<4x128xf32>
    %15 = arith.mulf %0, %14 : vector<4x128xf32>
    %c0_6 = arith.constant 0 : index
    %c0_7 = arith.constant 0 : index
    %16 = vector.load %arg3[%c0_6, %c0_7] : memref<1x128xf32, #tpu.memory_space<vmem>>, vector<1x128xf32>
    %17 = vector.broadcast %16 : vector<1x128xf32> to vector<4x128xf32>
    %18 = arith.mulf %15, %17 : vector<4x128xf32>
    %c0_8 = arith.constant 0 : index
    %c0_9 = arith.constant 0 : index
    %19 = vector.load %arg4[%c0_8, %c0_9] : memref<1x128xf32, #tpu.memory_space<vmem>>, vector<1x128xf32>
    %20 = vector.broadcast %19 : vector<1x128xf32> to vector<4x128xf32>
    %21 = arith.addf %18, %20 : vector<4x128xf32>
    %c0_10 = arith.constant 0 : index
    %c0_11 = arith.constant 0 : index
    %22 = vector.load %arg5[%c0_10, %c0_11] : memref<4x128xf32, #tpu.memory_space<vmem>>, vector<4x128xf32>
    tpu.vector_store %arg5[%c0_10, %c0_11], %21 {strides = array<i32>} : memref<4x128xf32, #tpu.memory_space<vmem>>, vector<4x128xf32>,
    return
  }
  func.func @transform_0(%arg0: i32) -> (i32, i32) {
    %c0_i32 = arith.constant 0 : i32
    %c0_i32_0 = arith.constant 0 : i32
    return %arg0, %c0_i32 : i32, i32
  }
  func.func @transform_1(%arg0: i32) -> (i32, i32) {
    %c0_i32 = arith.constant 0 : i32
    %c0_i32_0 = arith.constant 0 : i32
    %c0_i32_1 = arith.constant 0 : i32
    return %c0_i32, %c0_i32_0 : i32, i32
  }
  func.func @transform_2(%arg0: i32) -> (i32, i32) {
    %c0_i32 = arith.constant 0 : i32
    %c0_i32_0 = arith.constant 0 : i32
    %c0_i32_1 = arith.constant 0 : i32
    return %c0_i32, %c0_i32_0 : i32, i32
  }
  func.func @transform_3(%arg0: i32) -> (i32, i32) {
    %c0_i32 = arith.constant 0 : i32
    %c0_i32_0 = arith.constant 0 : i32
    %c0_i32_1 = arith.constant 0 : i32
    return %c0_i32, %c0_i32_0 : i32, i32
  }
  func.func @transform_4(%arg0: i32) -> (i32, i32) {
    %c0_i32 = arith.constant 0 : i32
    %c0_i32_0 = arith.constant 0 : i32
    return %arg0, %c0_i32 : i32, i32
  }
}

</mosaic_0001>

<bundles_post_ra>
// kernel: tpu_custom_call.1
= control target key start
LH: loop header
LB: loop body
LE: loop exit
PB: predicated region body
PF: predicated region fallthrough
CT: control target
= control target key end

     0   :  { %9 = vsyncpa [#allocation3], 0  ;;  %s471_s0 = inlined_call_operand.hbm [shape: f32[4,128], index: 0, kind: input, shape index: {}]   ;;  %s472_s1 = inlined_call_operand.hbm [shape: bf16[128,128], index: 1, kind: input, shape index: {}]   ;;  %s473_s2 = inlined_call_operand.vmem [shape: f32[1,128], index: 2, kind: input, shape index: {}]   ;;  %s474_s3 = inlined_call_operand.vmem [shape: f32[1,128], index: 3, kind: input, shape index: {}]   ;;  %s475_s4 = inlined_call_operand.hbm [shape: f32[4,128], index: 4, kind: output, shape index: {}]  }
   0x1   :  { %10 = vsyncpa [#allocation6], 0 }
   0x2   :  { %11 = vsyncpa [#allocation4], 0  ;;  %s390_s15 = smov [#allocation2]   ;;  %s391_s17 = smov [#allocation5]  }
   0x3   :  { %s18_s16 = sshll.u32 %s390_s15, 4  ;;  %s27_s18 = sshll.u32 %s391_s17, 4  ;;  %s19_s16 = int_to_ptr.vmem [resolvable:$true] %s18_s16  ;;  %s422_s18 = int_to_ptr.vmem [resolvable:$true] %s27_s18 }
   0x4   :  { %s318_s21 = scalar_lea.hbm %s471_s0, 64 }
   0x5   :  { %p319_p0 = scmp.ne.s32.totalorder %s471_s0, %s318_s21  ;;  %p322_p1 = scmp.lt.u32.totalorder %s318_s21, %s471_s0 }
   0x7   :  { %p324_p2 = pnand %p322_p1, %p319_p0 }
   0x9   :  { %327 = shalt.err (!%p324_p2)
}
   0xa   :  { %s328_s26 = scalar_lea.vmem %s19_s16, 64  ;;  %p333_p4 = scmp.lt.s32.totalorder %s19_s16, %s19_s16 }
   0xb   :  { %p329_p3 = scmp.ne.s32.totalorder %s19_s16, %s328_s26  ;;  %p334_p5 = scmp.lt.s32.totalorder %s328_s26, %s328_s26 }
   0xd   :  { %p335_p6 = por %p334_p5, %p333_p4 }
   0xf   :  { %p336_p7 = pnand %p335_p6, %p329_p3 }
  0x11   :  { %339 = shalt.err (!%p336_p7)
}
  0x12   :  { %21 = dma.hbm_to_vmem [thread:$0]  %s471_s0, 64, %s19_s16, [#allocation3]  }
  0x13   :  { %s340_s5 = scalar_lea.hbm %s472_s1, 1024 }
  0x14   :  { %p341_p8 = scmp.ne.s32.totalorder %s472_s1, %s340_s5  ;;  %p344_p9 = scmp.lt.u32.totalorder %s340_s5, %s472_s1 }
  0x16   :  { %p346_p10 = pnand %p344_p9, %p341_p8 }
  0x18   :  { %349 = shalt.err (!%p346_p10)
}
  0x19   :  { %s350_s10 = scalar_lea.vmem %s422_s18, 1024  ;;  %p355_p12 = scmp.lt.s32.totalorder %s422_s18, %s422_s18 }
  0x1a   :  { %p351_p11 = scmp.ne.s32.totalorder %s422_s18, %s350_s10  ;;  %p356_p13 = scmp.lt.s32.totalorder %s350_s10, %s350_s10 }
  0x1c   :  { %p357_p0 = por %p356_p13, %p355_p12 }
  0x1e   :  { %p358_p1 = pnand %p357_p0, %p351_p11 }
  0x20   :  { %361 = shalt.err (!%p358_p1)
}
  0x21   :  { %s392_s0 = smov 64   ;;  %s393_s11 = smov 4  }
  0x22   :  { %33 = dma.hbm_to_vmem [thread:$0]  %s472_s1, 1024, %s422_s18, [#allocation6], %s392_s0, %s392_s0, %s393_s11  }
  0x23   :  { %384 = dma.done.wait [#allocation3], 64  }
  0x24   :  { %385 = vsyncadd [#allocation3], 4294967232 }
  0x25   :  { %386 = dma.done.wait [#allocation6], 1024  }
  0x26   :  { %387 = vsyncadd [#allocation6], 4294966272  ;;  %v394_v0 = vmov 0.0   ;;  %vm395_vm0 = vmmov 0   ;;  %v308_v1 = vld [vmem:[#allocation5] sm:$0xff]   ;;  %v309_v2 = vld [vmem:[#allocation5 + $0x8] sm:$0xff]  }
  0x27   :  { %260 = vmatprep.subr.bf16.mxu1 %v394_v0  ;;  %280 = vmatprep.subr.bf16.mxu0 %v394_v0  ;;  %v310_v3 = vld [vmem:[#allocation5 + $0x10] sm:$0xff]   ;;  %v311_v4 = vld [vmem:[#allocation5 + $0x18] sm:$0xff]   ;;  %v312_v7 = vld [vmem:[#allocation5 + $0x20] sm:$0xff]   ;;  %s396_s17 = smov [#allocation7]  }
  0x28   :  { %276 = vmatprep.mubr.msk.bf16.mxu1 %vm395_vm0, %v394_v0  ;;  %296 = vmatprep.mubr.msk.bf16.mxu0 %vm395_vm0, %v394_v0  ;;  %v45_v5 = vld [vmem:[#allocation2] sm:$0xf]  ;;  %v313_v9 = vld [vmem:[#allocation5 + $0x28] sm:$0xff]   ;;  %v314_v11 = vld [vmem:[#allocation5 + $0x30] sm:$0xff]   ;;  %s222_s18 = sshll.u32 %s396_s17, 4  ;;  %s223_s18 = int_to_ptr.vmem [resolvable:$true] %s222_s18 }
  0x29   :  { %261 = vmatpush3.bf16.msra.mxu1 %v308_v1  ;;  %281 = vmatpush3.bf16.msra.mxu0 %v308_v1  ;;  %v46_v6 = vmul.f32 %v45_v5, %v45_v5  ;;  %v315_v13 = vld [vmem:[#allocation5 + $0x38] sm:$0xff]   ;;  %s362_s19 = scalar_lea.vmem %s223_s18, 64  ;;  %p367_p3 = scmp.lt.s32.totalorder %s223_s18, %s223_s18 }
  0x2a   :  { %262 = vmatprep.subr.bf16.mxu1 %v394_v0  ;;  %282 = vmatprep.subr.bf16.mxu0 %v394_v0  ;;  %v240_v27 = vld [vmem:[%s473_s2] ss:$0 sm:$0xff]  ;;  %p363_p2 = scmp.ne.s32.totalorder %s223_s18, %s362_s19  ;;  %p368_p4 = scmp.lt.s32.totalorder %s362_s19, %s362_s19 }
  0x2b   :  { %v47_v8 = vpack.c.bf16 %v46_v6, %v46_v6  ;;  %v241_v29 = vld [vmem:[%s474_s3] ss:$0 sm:$0xff] }
  0x2c   :  { %p369_p5 = por %p368_p4, %p367_p3 }
  0x2d   :  { %263 = vmatpush3.bf16.msra.mxu1 %v309_v2  ;;  %283 = vmatpush3.bf16.msra.mxu0 %v309_v2  ;;  %v48_v10 = vunpack.c.l.bf16 %v47_v8 }
  0x2e   :  { %264 = vmatprep.subr.bf16.mxu1 %v394_v0  ;;  %284 = vmatprep.subr.bf16.mxu0 %v394_v0  ;;  %p370_p6 = pnand %p369_p5, %p363_p2 }
  0x2f   :  { %v49_v12 = vsub.f32 %v46_v6, %v48_v10 }
  0x31   :  { %265 = vmatpush3.bf16.msra.mxu1 %v310_v3  ;;  %285 = vmatpush3.bf16.msra.mxu0 %v310_v3  ;;  %v50_v14 = vpack.c.bf16 %v49_v12, %v49_v12 }
  0x32   :  { %266 = vmatprep.subr.bf16.mxu1 %v394_v0  ;;  %286 = vmatprep.subr.bf16.mxu0 %v394_v0 }
  0x35   :  { %267 = vmatpush3.bf16.msra.mxu1 %v311_v4  ;;  %287 = vmatpush3.bf16.msra.mxu0 %v311_v4 }
  0x36   :  { %268 = vmatprep.subr.bf16.mxu1 %v394_v0  ;;  %288 = vmatprep.subr.bf16.mxu0 %v394_v0 }
  0x39   :  { %269 = vmatpush3.bf16.msra.mxu1 %v312_v7  ;;  %289 = vmatpush3.bf16.msra.mxu0 %v312_v7 }
  0x3a   :  { %270 = vmatprep.subr.bf16.mxu1 %v394_v0  ;;  %290 = vmatprep.subr.bf16.mxu0 %v394_v0 }
  0x3d   :  { %271 = vmatpush3.bf16.msra.mxu1 %v313_v9  ;;  %291 = vmatpush3.bf16.msra.mxu0 %v313_v9 }
  0x3e   :  { %272 = vmatprep.subr.bf16.mxu1 %v394_v0  ;;  %292 = vmatprep.subr.bf16.mxu0 %v394_v0 }
  0x41   :  { %273 = vmatpush3.bf16.msra.mxu1 %v314_v11  ;;  %293 = vmatpush3.bf16.msra.mxu0 %v314_v11 }
  0x42   :  { %274 = vmatprep.subr.bf16.mxu1 %v394_v0  ;;  %294 = vmatprep.subr.bf16.mxu0 %v394_v0 }
  0x45   :  { %275 = vmatpush3.bf16.msra.mxu1 %v315_v13  ;;  %295 = vmatpush3.bf16.msra.mxu0 %v315_v13 }
  0x48   :  { %277 = vmatmul.mubr.bf16.vlgmr.msra.gmra.mrb[0].mxu1 %v50_v14  ;;  %297 = vmatmul.mubr.bf16.vlgmr.msra.gmra.mrb[0].mxu0 %v47_v8 }
 0x11b   :  { %v149_v15 = vpop.f32.mrb[0].mxu1  ;;  %v189_v16 = vpop.f32.mrb[0].mxu0 }
 0x11c   :  { %v190_v17 = vadd.f32 %v189_v16, %v149_v15  ;;  %v278_v18 = vpop.f32.mrb[1].mxu1  ;;  %v298_v19 = vpop.f32.mrb[1].mxu0 }
 0x11d   :  { %v152_v20 = vpop.f32.mrb[2].mxu1  ;;  %v192_v21 = vpop.f32.mrb[2].mxu0 }
 0x11e   :  { %v195_v22 = vmul.f32 0.03125, %v190_v17  ;;  %v279_v23 = vpop.f32.mrb[3].mxu1  ;;  %v299_v24 = vpop.f32.mrb[3].mxu0 }
 0x120   :  { %v196_v25 = vadd.f32 1e-08, %v195_v22 }
 0x122   :  { %316 = vrsqrt.f32 %v196_v25 }
 0x12c   :  { %v317_v26 = vpop.eup %316 }
 0x12d   :  { %v198_v28 = vmul.f32 %v317_v26, %v45_v5 }
 0x12f   :  { %v206_v30 = vmul.f32 %v240_v27, %v198_v28 }
 0x131   :  { %v214_v31 = vadd.f32 %v241_v29, %v206_v30 }
 0x133   :  { %215 = vst [vmem:[#allocation7] sm:$0xf] %v214_v31 }
 0x134   :  { %373 = shalt.err (!%p370_p6)
}
 0x135   :  { %s374_s21 = scalar_lea.hbm %s475_s4, 64 }
 0x136   :  { %p375_p7 = scmp.ne.s32.totalorder %s475_s4, %s374_s21  ;;  %p378_p8 = scmp.lt.u32.totalorder %s374_s21, %s475_s4 }
 0x138   :  { %p380_p9 = pnand %p378_p8, %p375_p7 }
 0x13a   :  { %383 = shalt.err (!%p380_p9)
}
 0x13b   :  { %225 = dma.vmem_to_hbm [thread:$0]  %s223_s18, 64, %s475_s4, [#allocation4]  }
 0x13c   :  { %388 = dma.done.wait [#allocation4], 64  }
 0x13d   :  { %389 = vsyncadd [#allocation4], 4294967232 }
 0x13e   :  { %229 = vsyncpa [#allocation3], 1 }
 0x13f   :  { %230 = vsyncpa [#allocation6], 1 }
 0x140   :  { %231 = vsyncpa [#allocation4], 1 }

</bundles_post_ra>
